<compile_context>
chip_gen: v7x
topology: tpu7x:2x2x1
jax: 0.10.0
libtpu: 0.0.40
codegen_flags: <defaults>
</compile_context>

<pallas_src>
import jax
import jax.numpy as jnp
from jax.experimental import pallas as pl
from jax.experimental.pallas import tpu as pltpu


def mlp_softmax_kernel(p_ref, x_ref, o_ref):
    # p_ref: (12,) f32 in SMEM -> [w1.flat(4), b1(2), w2.flat(4), b2(2)] (row-major, (in,out))
    # x_ref: (2, B) in VMEM (batch on the lane axis)
    # o_ref: (2, B) in VMEM
    x = x_ref[...].astype(jnp.float32)
    x0 = x[0:1, :]                       # (1, B)
    x1 = x[1:2, :]

    # fc1 + ReLU: h[j] = sum_i W1[i, j] * x[i] + b1[j]  (scalar-operand VPU FMAs)
    h0 = jnp.maximum(x0 * p_ref[0] + x1 * p_ref[2] + p_ref[4], 0.0)
    h1 = jnp.maximum(x0 * p_ref[1] + x1 * p_ref[3] + p_ref[5], 0.0)

    # fc2
    z0 = h0 * p_ref[6] + h1 * p_ref[8] + p_ref[10]
    z1 = h0 * p_ref[7] + h1 * p_ref[9] + p_ref[11]

    # 2-class softmax over dim=1 == sigmoid of the logit gap (single stable EUP path).
    p0 = jax.nn.sigmoid(z0 - z1)         # (1, B)
    p1 = 1.0 - p0

    o_ref[0:1, :] = p0.astype(o_ref.dtype)
    o_ref[1:2, :] = p1.astype(o_ref.dtype)


def pack_params(w1, b1, w2, b2):
    """Flatten [W1 (2,2, row-major (in,out)); b1 (2,); W2 (2,2); b2 (2,)] into a (12,) f32 vector."""
    return jnp.concatenate(
        [w1.reshape(-1), b1.reshape(-1), w2.reshape(-1), b2.reshape(-1)]
    ).astype(jnp.float32)


def simple_model_forward(x, params12, *, lane_tile=512):
    B, _ = x.shape
    O = 2
    xt = jnp.transpose(x)                # (F, B): batch onto the lane axis (layout plumbing)

    if B >= lane_tile:
        # Scaled path: lane-dense 1-D batch grid, sharded across TensorCores on v7x.
        n_tiles = pl.cdiv(B, lane_tile)
        Bp = n_tiles * lane_tile
        if Bp != B:
            xt = jnp.pad(xt, ((0, 0), (0, Bp - B)))
        out_t = pl.pallas_call(
            mlp_softmax_kernel,
            out_shape=jax.ShapeDtypeStruct((O, Bp), x.dtype),
            grid=(n_tiles,),
            in_specs=[
                pl.BlockSpec(memory_space=pltpu.SMEM),                 # params (12,) scalars
                pl.BlockSpec((2, lane_tile), lambda i: (0, i)),        # x tile (F, lane_tile)
            ],
            out_specs=pl.BlockSpec((O, lane_tile), lambda i: (0, i)),
            compiler_params=pltpu.CompilerParams(
                dimension_semantics=("parallel",)),
        )(params12, xt)
        out_t = out_t[:, :B]
    else:
        # Tiny-batch path: grid-less, whole arrays resident in VMEM.
        out_t = pl.pallas_call(
            mlp_softmax_kernel,
            out_shape=jax.ShapeDtypeStruct((O, B), x.dtype),
            in_specs=[
                pl.BlockSpec(memory_space=pltpu.SMEM),                 # params (12,) scalars
                pl.BlockSpec(memory_space=pltpu.MemorySpace.VMEM),     # x (F, B)
            ],
            out_specs=pl.BlockSpec(memory_space=pltpu.MemorySpace.VMEM),
        )(params12, xt)

    return jnp.transpose(out_t)          # back to (B, O) to match the module's output layout


def reference_forward(x, w1, b1, w2, b2):
    h = jnp.maximum(x @ w1 + b1, 0.0)
    z = h @ w2 + b2
    return jax.nn.softmax(z, axis=1)


if __name__ == "__main__":
    key = jax.random.PRNGKey(0)
    k_x, k_w1, k_b1, k_w2, k_b2 = jax.random.split(key, 5)

    # Module implies 2 input features / 2 output features; small batch of 8.
    B, F, H, O = 8, 2, 2, 2

    x = jax.random.normal(k_x, (B, F), dtype=jnp.float32)

    # PyTorch Linear default init is U(-1/sqrt(fan_in), 1/sqrt(fan_in)); weights stored
    # as (in_features, out_features) so y = x @ W + b == PyTorch's x @ W.T + b.
    bound1 = 1.0 / jnp.sqrt(F)
    bound2 = 1.0 / jnp.sqrt(H)
    w1 = jax.random.uniform(k_w1, (F, H), minval=-bound1, maxval=bound1, dtype=jnp.float32)
    b1 = jax.random.uniform(k_b1, (H,), minval=-bound1, maxval=bound1, dtype=jnp.float32)
    w2 = jax.random.uniform(k_w2, (H, O), minval=-bound2, maxval=bound2, dtype=jnp.float32)
    b2 = jax.random.uniform(k_b2, (O,), minval=-bound2, maxval=bound2, dtype=jnp.float32)

    params12 = pack_params(w1, b1, w2, b2)

    out = simple_model_forward(x, params12)
    out = jax.block_until_ready(out)

    ref = reference_forward(x, w1, b1, w2, b2)
    assert out.shape == (B, O)
    assert jnp.allclose(out, ref, atol=1e-5, rtol=1e-5), "mismatch vs reference"

    print("KERNEL_OK")
</pallas_src>

<mosaic_0001>
module attributes {stable_mosaic.version = 11 : i64} {
  func.func @mlp_softmax_kernel(%arg0: memref<12xf32, #tpu.memory_space<smem>>, %arg1: memref<2x8xf32, #tpu.memory_space<vmem>>, %arg2: memref<2x8xf32, #tpu.memory_space<vmem>>) attributes {dimension_semantics = [], scalar_prefetch = 0 : i64, scratch_operands = 0 : i64, tpu.core_type = #tpu.core_type<tc>} {
    %c0 = arith.constant 0 : index
    %c0_0 = arith.constant 0 : index
    %0 = vector.load %arg1[%c0, %c0_0] : memref<2x8xf32, #tpu.memory_space<vmem>>, vector<2x8xf32>
    %1 = vector.extract_strided_slice %0 {offsets = [0, 0], sizes = [1, 8], strides = [1, 1]} : vector<2x8xf32> to vector<1x8xf32>
    %2 = vector.extract_strided_slice %0 {offsets = [1, 0], sizes = [1, 8], strides = [1, 1]} : vector<2x8xf32> to vector<1x8xf32>
    %c0_1 = arith.constant 0 : index
    %3 = memref.load %arg0[%c0_1] : memref<12xf32, #tpu.memory_space<smem>>
    %4 = vector.broadcast %3 : f32 to vector<1x8xf32>
    %5 = arith.mulf %1, %4 : vector<1x8xf32>
    %c2 = arith.constant 2 : index
    %6 = memref.load %arg0[%c2] : memref<12xf32, #tpu.memory_space<smem>>
    %7 = vector.broadcast %6 : f32 to vector<1x8xf32>
    %8 = arith.mulf %2, %7 : vector<1x8xf32>
    %9 = arith.addf %5, %8 : vector<1x8xf32>
    %c4 = arith.constant 4 : index
    %10 = memref.load %arg0[%c4] : memref<12xf32, #tpu.memory_space<smem>>
    %11 = vector.broadcast %10 : f32 to vector<1x8xf32>
    %12 = arith.addf %9, %11 : vector<1x8xf32>
    %cst = arith.constant 0.000000e+00 : f32
    %13 = vector.broadcast %cst : f32 to vector<1x8xf32>
    %14 = arith.maximumf %12, %13 : vector<1x8xf32>
    %c1 = arith.constant 1 : index
    %15 = memref.load %arg0[%c1] : memref<12xf32, #tpu.memory_space<smem>>
    %16 = vector.broadcast %15 : f32 to vector<1x8xf32>
    %17 = arith.mulf %1, %16 : vector<1x8xf32>
    %c3 = arith.constant 3 : index
    %18 = memref.load %arg0[%c3] : memref<12xf32, #tpu.memory_space<smem>>
    %19 = vector.broadcast %18 : f32 to vector<1x8xf32>
    %20 = arith.mulf %2, %19 : vector<1x8xf32>
    %21 = arith.addf %17, %20 : vector<1x8xf32>
    %c5 = arith.constant 5 : index
    %22 = memref.load %arg0[%c5] : memref<12xf32, #tpu.memory_space<smem>>
    %23 = vector.broadcast %22 : f32 to vector<1x8xf32>
    %24 = arith.addf %21, %23 : vector<1x8xf32>
    %cst_2 = arith.constant 0.000000e+00 : f32
    %25 = vector.broadcast %cst_2 : f32 to vector<1x8xf32>
    %26 = arith.maximumf %24, %25 : vector<1x8xf32>
    %c6 = arith.constant 6 : index
    %27 = memref.load %arg0[%c6] : memref<12xf32, #tpu.memory_space<smem>>
    %28 = vector.broadcast %27 : f32 to vector<1x8xf32>
    %29 = arith.mulf %14, %28 : vector<1x8xf32>
    %c8 = arith.constant 8 : index
    %30 = memref.load %arg0[%c8] : memref<12xf32, #tpu.memory_space<smem>>
    %31 = vector.broadcast %30 : f32 to vector<1x8xf32>
    %32 = arith.mulf %26, %31 : vector<1x8xf32>
    %33 = arith.addf %29, %32 : vector<1x8xf32>
    %c10 = arith.constant 10 : index
    %34 = memref.load %arg0[%c10] : memref<12xf32, #tpu.memory_space<smem>>
    %35 = vector.broadcast %34 : f32 to vector<1x8xf32>
    %36 = arith.addf %33, %35 : vector<1x8xf32>
    %c7 = arith.constant 7 : index
    %37 = memref.load %arg0[%c7] : memref<12xf32, #tpu.memory_space<smem>>
    %38 = vector.broadcast %37 : f32 to vector<1x8xf32>
    %39 = arith.mulf %14, %38 : vector<1x8xf32>
    %c9 = arith.constant 9 : index
    %40 = memref.load %arg0[%c9] : memref<12xf32, #tpu.memory_space<smem>>
    %41 = vector.broadcast %40 : f32 to vector<1x8xf32>
    %42 = arith.mulf %26, %41 : vector<1x8xf32>
    %43 = arith.addf %39, %42 : vector<1x8xf32>
    %c11 = arith.constant 11 : index
    %44 = memref.load %arg0[%c11] : memref<12xf32, #tpu.memory_space<smem>>
    %45 = vector.broadcast %44 : f32 to vector<1x8xf32>
    %46 = arith.addf %43, %45 : vector<1x8xf32>
    %47 = arith.subf %36, %46 : vector<1x8xf32>
    %48 = arith.negf %47 : vector<1x8xf32>
    %49 = math.exp %48 : vector<1x8xf32>
    %cst_3 = arith.constant 1.000000e+00 : f32
    %50 = vector.broadcast %cst_3 : f32 to vector<1x8xf32>
    %51 = arith.addf %50, %49 : vector<1x8xf32>
    %52 = arith.divf %50, %51 : vector<1x8xf32>
    %cst_4 = arith.constant 1.000000e+00 : f32
    %53 = vector.broadcast %cst_4 : f32 to vector<1x8xf32>
    %54 = arith.subf %53, %52 : vector<1x8xf32>
    %c0_5 = arith.constant 0 : index
    %c0_6 = arith.constant 0 : index
    %55 = vector.load %arg2[%c0_5, %c0_6] : memref<2x8xf32, #tpu.memory_space<vmem>>, vector<1x8xf32>
    tpu.vector_store %arg2[%c0_5, %c0_6], %52 {strides = array<i32>} : memref<2x8xf32, #tpu.memory_space<vmem>>, vector<1x8xf32>,
    %c1_7 = arith.constant 1 : index
    %c0_8 = arith.constant 0 : index
    %56 = vector.load %arg2[%c1_7, %c0_8] : memref<2x8xf32, #tpu.memory_space<vmem>>, vector<1x8xf32>
    tpu.vector_store %arg2[%c1_7, %c0_8], %54 {strides = array<i32>} : memref<2x8xf32, #tpu.memory_space<vmem>>, vector<1x8xf32>,
    return
  }
}

</mosaic_0001>

<bundles_post_ra>
// kernel: tpu_custom_call.1
= control target key start
LH: loop header
LB: loop body
LE: loop exit
PB: predicated region body
PF: predicated region fallthrough
CT: control target
= control target key end

     0   :  { %7 = vsyncpa [#allocation4], 0  ;;  %s196_s0 = inlined_call_operand.hbm [shape: f32[12], index: 0, kind: input, shape index: {}]   ;;  %s197_s1 = inlined_call_operand.vmem [shape: f32[2,8], index: 1, kind: input, shape index: {}]   ;;  %s198_s2 = inlined_call_operand.hbm [shape: f32[2,8], index: 2, kind: output, shape index: {}]  }
   0x1   :  { %8 = vsyncpa [#allocation3], 0  ;;  %s116_s11 = scalar_lea.hbm %s196_s0, 16 }
   0x2   :  { %p117_p0 = scmp.ne.s32.totalorder %s196_s0, %s116_s11  ;;  %p120_p1 = scmp.lt.u32.totalorder %s116_s11, %s196_s0 }
   0x4   :  { %p122_p2 = pnand %p120_p1, %p117_p0 }
   0x6   :  { %125 = shalt.err (!%p122_p2)
}
   0x7   :  { %s152_s16 = smov [#allocation2]  }
   0x8   :  { %16 = dma.hbm_to_smem %s196_s0, 16, %s152_s16, [#allocation4]  }
   0x9   :  { %148 = dma.done.wait [#allocation4], 16  }
   0xa   :  { %149 = vsyncadd [#allocation4], 4294967280 }
   0xb   :  { %22 = sfence }
   0xc   :  { %s24_s19 = sld [smem:[#allocation2]]  ;;  %s98_s20 = sld [smem:[#allocation2 + $0x2]]  ;;  %v23_v0 = vld [vmem:[%s197_s1] sm:$0x3]  ;;  %vm80_vm0 = vcmask 57344  }
   0xd   :  { %s100_s21 = sld [smem:[#allocation2 + $0x1]]  ;;  %s99_s22 = sld [smem:[#allocation2 + $0x4]] }
   0xe   :  { %s101_s23 = sld [smem:[#allocation2 + $0x3]]  ;;  %s102_s26 = sld [smem:[#allocation2 + $0x5]] }
   0xf   :  { %s103_s27 = sld [smem:[#allocation2 + $0x6]]  ;;  %s106_s28 = sld [smem:[#allocation2 + $0x7]] }
  0x10   :  { %s104_s0 = sld [smem:[#allocation2 + $0x8]]  ;;  %s107_s29 = sld [smem:[#allocation2 + $0x9]] }
  0x11   :  { %s105_s30 = sld [smem:[#allocation2 + $0xa]]  ;;  %s108_s1 = sld [smem:[#allocation2 + $0xb]] }
  0x12   :  { %v25_v1 = vstv %s24_s19  ;;  %v28_v2 = vstv %s98_s20  ;;  %s153_s3 = smov [#allocation5]  }
  0x13   :  { %v26_v3 = vmul.f32 %v25_v1, %v23_v0  ;;  %v29_v4 = vmul.f32 %v28_v2, %v23_v0  ;;  %v39_v5 = vstv %s100_s21  ;;  %v35_v10 = vstv %s99_s22  ;;  %s89_s4 = sshll.u32 %s153_s3, 4  ;;  %s90_s4 = int_to_ptr.vmem [resolvable:$true] %s89_s4 }
  0x14   :  { %v42_v6 = vstv %s101_s23  ;;  %v40_v8 = vmul.f32 %v39_v5, %v23_v0  ;;  %v49_v13 = vstv %s102_s26  ;;  %s126_s5 = scalar_lea.vmem %s90_s4, 32  ;;  %p131_p4 = scmp.lt.s32.totalorder %s90_s4, %s90_s4 }
  0x15   :  { %v31_v7 = vrot.slane %v29_v4, 1  ;;  %v43_v9 = vmul.f32 %v42_v6, %v23_v0  ;;  %v53_v16 = vstv %s103_s27  ;;  %v63_v17 = vstv %s106_s28  ;;  %p127_p3 = scmp.ne.s32.totalorder %s90_s4, %s126_s5  ;;  %p132_p5 = scmp.lt.s32.totalorder %s126_s5, %s126_s5 }
  0x16   :  { %v56_v20 = vstv %s104_s0  ;;  %v66_v21 = vstv %s107_s29 }
  0x17   :  { %v33_v11 = vadd.f32 %v31_v7, %v26_v3  ;;  %v45_v12 = vrot.slane %v43_v9, 1  ;;  %v60_v27 = vstv %s105_s30  ;;  %v70_v28 = vstv %s108_s1  ;;  %p133_p6 = por %p132_p5, %p131_p4 }
  0x19   :  { %v36_v14 = vadd.f32 %v35_v10, %v33_v11  ;;  %v47_v15 = vadd.f32 %v45_v12, %v40_v8  ;;  %p134_p7 = pnand %p133_p6, %p127_p3 }
  0x1b   :  { %v37_v18 = vmax.f32 %v36_v14, 0.0  ;;  %v50_v19 = vadd.f32 %v49_v13, %v47_v15 }
  0x1d   :  { %v51_v22 = vmax.f32 %v50_v19, 0.0  ;;  %v54_v23 = vmul.f32 %v53_v16, %v37_v18  ;;  %v64_v24 = vmul.f32 %v63_v17, %v37_v18 }
  0x1f   :  { %v57_v25 = vmul.f32 %v56_v20, %v51_v22  ;;  %v67_v26 = vmul.f32 %v66_v21, %v51_v22 }
  0x21   :  { %v58_v29 = vadd.f32 %v57_v25, %v54_v23  ;;  %v68_v30 = vadd.f32 %v67_v26, %v64_v24 }
  0x23   :  { %v61_v31 = vadd.f32 %v60_v27, %v58_v29  ;;  %v71_v32 = vadd.f32 %v70_v28, %v68_v30 }
  0x25   :  { %v72_v33 = vsub.f32 %v61_v31, %v71_v32 }
  0x27   :  { %v109_v34 = vmul.f32 -1.442695, %v72_v33 }
  0x29   :  { %112 = vpow2.f32 %v109_v34 }
  0x33   :  { %v113_v35 = vpop.eup %112 }
  0x34   :  { %v76_v36 = vadd.f32 1.0, %v113_v35 }
  0x36   :  { %114 = vrcp.f32 %v76_v36 }
  0x40   :  { %v115_v37 = vpop.eup %114 }
  0x41   :  { %81 = vst.msk [vmem:[#allocation5] sm:$0x1] %vm80_vm0, %v115_v37  ;;  %v79_v38 = vsub.f32 1.0, %v115_v37 }
  0x43   :  { %82 = vst.msk [vmem:[#allocation5 + $0x1] sm:$0x1] %vm80_vm0, %v79_v38 }
  0x44   :  { %137 = shalt.err (!%p134_p7)
}
  0x45   :  { %s138_s8 = scalar_lea.hbm %s198_s2, 32 }
  0x46   :  { %p139_p8 = scmp.ne.s32.totalorder %s198_s2, %s138_s8  ;;  %p142_p9 = scmp.lt.u32.totalorder %s138_s8, %s198_s2 }
  0x48   :  { %p144_p10 = pnand %p142_p9, %p139_p8 }
  0x4a   :  { %147 = shalt.err (!%p144_p10)
}
  0x4b   :  { %92 = dma.vmem_to_hbm [thread:$0]  %s90_s4, 32, %s198_s2, [#allocation3]  }
  0x4c   :  { %150 = dma.done.wait [#allocation3], 32  }
  0x4d   :  { %151 = vsyncadd [#allocation3], 4294967264 }
  0x4e   :  { %96 = vsyncpa [#allocation3], 1 }
  0x4f   :  { %97 = vsyncpa [#allocation4], 1 }

</bundles_post_ra>
